<compile_context>
chip_gen: v5e
topology: v5e:2x2
jax: 0.10.0
libtpu: 0.0.40
codegen_flags: <defaults>
</compile_context>

<pallas_src>
import functools

import jax
import jax.numpy as jnp
from jax.experimental import pallas as pl
from jax.experimental.pallas import tpu as pltpu


def _round_up(x, m):
    return -(-x // m) * m


def _f1_partial_kernel(out_ref, tgt_ref, partial_ref, *, epsilon, n_rows, tile_rows):
    """Partial sum of clamped per-row f1 scores over one batch tile."""
    i = pl.program_id(0)

    probas = out_ref[...].astype(jnp.float32)                  # [tile_rows, C]
    target = tgt_ref[...].astype(jnp.float32)                  # [tile_rows, C]

    # Per-row reductions: padded boundary rows cannot contaminate valid rows.
    tp = jnp.sum(probas * target, axis=1, keepdims=True)       # [tile_rows, 1]
    precision = tp / (jnp.sum(probas, axis=1, keepdims=True) + epsilon)
    recall = tp / (jnp.sum(target, axis=1, keepdims=True) + epsilon)
    f1 = 2.0 * precision * recall / (precision + recall + epsilon)
    f1 = jnp.clip(f1, epsilon, 1.0 - epsilon)

    # Single cheap mask on the lane-sparse f1 column (handles N % tile_rows != 0).
    # It is what discards NaN/Inf produced from the undefined padded rows.
    row_ids = i * tile_rows + jax.lax.broadcasted_iota(jnp.int32, (tile_rows, 1), 0)
    f1 = jnp.where(row_ids < n_rows, f1, 0.0)

    psum = jnp.sum(f1)                                          # scalar partial sum
    # Lane-dense (1, 128) partial block; final reduce happens in the wrapper.
    partial_ref[...] = jnp.full((1, 128), psum, dtype=jnp.float32)


def _pick_tile_rows(n_rows, n_cols, itemsize, budget_bytes=6 << 20, min_grid=2):
    """Largest sublane-aligned row tile whose *padded* per-input block fits the budget.

    Accounts for VMEM lane padding (last dim rounds up to 128) so the real
    block size — not the logical one — is what is budgeted.  Also caps the
    tile so the grid has >= min_grid steps (v7x megacore sharding) whenever
    the batch is splittable.
    """
    padded_cols = _round_up(n_cols, 128)            # VMEM pads lanes to 128
    row_bytes = padded_cols * itemsize
    cap = max(8, budget_bytes // row_bytes)
    cap = max(8, (cap // 8) * 8)                    # sublane aligned
    need = _round_up(n_rows, 8)                     # batch rounded to sublane multiple
    tile = min(cap, need)
    # Guarantee >= min_grid grid steps when the batch can be split at all, so
    # dimension_semantics=("parallel",) lets v7x's 2 TensorCores share the stream.
    if n_rows > 8:
        half = max(8, _round_up(-(-n_rows // min_grid), 8))
        tile = min(tile, half)
    if tile >= 16:                                  # bf16 packed-tile friendly
        tile = (tile // 16) * 16
    return tile


def f1_loss(output, target, *, epsilon=1e-7, tile_rows=None,
            budget_bytes=6 << 20, vmem_limit_bytes=48 << 20):
    """Pallas implementation of F1_Loss.forward. Inputs: [N, C] arrays."""
    N, C = output.shape
    assert target.shape == (N, C)

    itemsize_out = jnp.dtype(output.dtype).itemsize
    itemsize_tgt = jnp.dtype(target.dtype).itemsize
    if tile_rows is None:
        tile_rows = _pick_tile_rows(N, C, max(itemsize_out, itemsize_tgt),
                                    budget_bytes=budget_bytes)

    grid = pl.cdiv(N, tile_rows)
    kernel = functools.partial(_f1_partial_kernel, epsilon=epsilon,
                               n_rows=N, tile_rows=tile_rows)

    cost = pl.CostEstimate(
        flops=4 * N * C,
        transcendentals=0,
        bytes_accessed=N * C * (itemsize_out + itemsize_tgt) + grid * 512,
    )

    partials = pl.pallas_call(
        kernel,
        out_shape=jax.ShapeDtypeStruct((1, grid * 128), jnp.float32),
        grid_spec=pltpu.PrefetchScalarGridSpec(
            num_scalar_prefetch=0,
            grid=(grid,),
            in_specs=[
                pl.BlockSpec((tile_rows, C), lambda i: (i, 0)),
                pl.BlockSpec((tile_rows, C), lambda i: (i, 0)),
            ],
            out_specs=pl.BlockSpec((1, 128), lambda i: (0, i)),
        ),
        compiler_params=pltpu.CompilerParams(
            dimension_semantics=("parallel",),
            vmem_limit_bytes=vmem_limit_bytes,
        ),
        cost_estimate=cost,
    )(output, target)

    per_block = partials.reshape(grid, 128)[:, 0]               # one lane per block
    return 1.0 - jnp.sum(per_block) / jnp.float32(N)


def f1_loss_ref(output, target, epsilon=1e-7):
    """Pure-JAX reference matching the PyTorch module."""
    probas = output.astype(jnp.float32)
    target = target.astype(jnp.float32)
    tp = (probas * target).sum(axis=1)
    precision = tp / (probas.sum(axis=1) + epsilon)
    recall = tp / (target.sum(axis=1) + epsilon)
    f1 = 2.0 * precision * recall / (precision + recall + epsilon)
    f1 = jnp.clip(f1, epsilon, 1.0 - epsilon)
    return 1.0 - f1.mean()


if __name__ == "__main__":
    key = jax.random.PRNGKey(0)
    k_logits, k_labels, k_logits2, k_labels2 = jax.random.split(key, 4)

    # Case 1: small f32 batch (auto-tiler splits it into 2 grid steps).
    N, C = 16, 32
    logits = jax.random.normal(k_logits, (N, C), dtype=jnp.float32)
    probas = jax.nn.softmax(logits, axis=-1)                    # "output"
    labels = jax.random.randint(k_labels, (N,), 0, C)
    target = jax.nn.one_hot(labels, C, dtype=jnp.float32)       # "target"
    loss = jax.block_until_ready(f1_loss(probas, target))
    ref = jax.block_until_ready(f1_loss_ref(probas, target))
    assert jnp.allclose(loss, ref, atol=1e-5, rtol=1e-5), (loss, ref)

    # Case 2: bf16 inputs + batch not divisible by the tile (masked boundary path).
    N2, C2 = 13, 40
    logits2 = jax.random.normal(k_logits2, (N2, C2), dtype=jnp.float32)
    probas2 = jax.nn.softmax(logits2, axis=-1).astype(jnp.bfloat16)
    labels2 = jax.random.randint(k_labels2, (N2,), 0, C2)
    target2 = jax.nn.one_hot(labels2, C2, dtype=jnp.bfloat16)
    loss2 = jax.block_until_ready(f1_loss(probas2, target2))
    ref2 = jax.block_until_ready(f1_loss_ref(probas2, target2))
    assert jnp.allclose(loss2, ref2, atol=1e-5, rtol=1e-5), (loss2, ref2)

    print("KERNEL_OK")
</pallas_src>

<mosaic_0001>
module attributes {stable_mosaic.version = 11 : i64} {
  func.func @_f1_partial_kernel(%arg0: i32, %arg1: memref<8x32xf32, #tpu.memory_space<vmem>>, %arg2: memref<8x32xf32, #tpu.memory_space<vmem>>, %arg3: memref<1x128xf32, #tpu.memory_space<vmem>>) attributes {dimension_semantics = [#tpu.dimension_semantics<parallel>], iteration_bounds = array<i64: 2>, scalar_prefetch = 0 : i64, scratch_operands = 0 : i64, tpu.core_type = #tpu.core_type<tc>, window_params = [{transform_indices = @transform_0, window_bounds = array<i64: 8, 32>}, {transform_indices = @transform_1, window_bounds = array<i64: 8, 32>}, {transform_indices = @transform_2, window_bounds = array<i64: 1, 128>}]} {
    %c0 = arith.constant 0 : index
    %c0_0 = arith.constant 0 : index
    %0 = vector.load %arg1[%c0, %c0_0] : memref<8x32xf32, #tpu.memory_space<vmem>>, vector<8x32xf32>
    %c0_1 = arith.constant 0 : index
    %c0_2 = arith.constant 0 : index
    %1 = vector.load %arg2[%c0_1, %c0_2] : memref<8x32xf32, #tpu.memory_space<vmem>>, vector<8x32xf32>
    %2 = arith.mulf %0, %1 : vector<8x32xf32>
    %cst = arith.constant dense<0.000000e+00> : vector<8xf32>
    %3 = vector.multi_reduction <add>, %2, %cst [1] : vector<8x32xf32> to vector<8xf32>
    %4 = vector.shape_cast %3 : vector<8xf32> to vector<8x1xf32>
    %cst_3 = arith.constant dense<0.000000e+00> : vector<8xf32>
    %5 = vector.multi_reduction <add>, %0, %cst_3 [1] : vector<8x32xf32> to vector<8xf32>
    %6 = vector.shape_cast %5 : vector<8xf32> to vector<8x1xf32>
    %cst_4 = arith.constant 1.000000e-07 : f32
    %7 = vector.broadcast %cst_4 : f32 to vector<8x1xf32>
    %8 = arith.addf %6, %7 : vector<8x1xf32>
    %9 = arith.divf %4, %8 : vector<8x1xf32>
    %cst_5 = arith.constant dense<0.000000e+00> : vector<8xf32>
    %10 = vector.multi_reduction <add>, %1, %cst_5 [1] : vector<8x32xf32> to vector<8xf32>
    %11 = vector.shape_cast %10 : vector<8xf32> to vector<8x1xf32>
    %cst_6 = arith.constant 1.000000e-07 : f32
    %12 = vector.broadcast %cst_6 : f32 to vector<8x1xf32>
    %13 = arith.addf %11, %12 : vector<8x1xf32>
    %14 = arith.divf %4, %13 : vector<8x1xf32>
    %cst_7 = arith.constant 2.000000e+00 : f32
    %15 = vector.broadcast %cst_7 : f32 to vector<8x1xf32>
    %16 = arith.mulf %15, %9 : vector<8x1xf32>
    %17 = arith.mulf %16, %14 : vector<8x1xf32>
    %18 = arith.addf %9, %14 : vector<8x1xf32>
    %cst_8 = arith.constant 1.000000e-07 : f32
    %19 = vector.broadcast %cst_8 : f32 to vector<8x1xf32>
    %20 = arith.addf %18, %19 : vector<8x1xf32>
    %21 = arith.divf %17, %20 : vector<8x1xf32>
    %cst_9 = arith.constant 1.000000e-07 : f32
    %cst_10 = arith.constant 0.99999988 : f32
    %22 = vector.broadcast %cst_9 : f32 to vector<8x1xf32>
    %23 = arith.maximumf %22, %21 : vector<8x1xf32>
    %24 = vector.broadcast %cst_10 : f32 to vector<8x1xf32>
    %25 = arith.minimumf %24, %23 : vector<8x1xf32>
    %c8_i32 = arith.constant 8 : i32
    %26 = arith.muli %arg0, %c8_i32 : i32
    %27 = tpu.iota {dimensions = array<i32: 0>} : vector<8x1xi32>
    %28 = vector.broadcast %26 : i32 to vector<8x1xi32>
    %29 = arith.addi %28, %27 : vector<8x1xi32>
    %c16_i32 = arith.constant 16 : i32
    %30 = vector.broadcast %c16_i32 : i32 to vector<8x1xi32>
    %31 = arith.cmpi slt, %29, %30 : vector<8x1xi32>
    %cst_11 = arith.constant 0.000000e+00 : f32
    %32 = vector.broadcast %cst_11 : f32 to vector<8x1xf32>
    %33 = arith.select %31, %25, %32 : vector<8x1xi1>, vector<8x1xf32>
    %34 = vector.shape_cast %33 : vector<8x1xf32> to vector<1x8x1xf32>
    %cst_12 = arith.constant dense<0.000000e+00> : vector<1xf32>
    %35 = vector.multi_reduction <add>, %34, %cst_12 [1, 2] : vector<1x8x1xf32> to vector<1xf32>
    %36 = vector.shape_cast %35 : vector<1xf32> to vector<1x1x1xf32>
    %37 = vector.extract %36[0, 0, 0] : f32 from vector<1x1x1xf32>
    %38 = vector.broadcast %37 : f32 to vector<1x128xf32>
    %c0_13 = arith.constant 0 : index
    %c0_14 = arith.constant 0 : index
    %39 = vector.load %arg3[%c0_13, %c0_14] : memref<1x128xf32, #tpu.memory_space<vmem>>, vector<1x128xf32>
    tpu.vector_store %arg3[%c0_13, %c0_14], %38 {strides = array<i32>} : memref<1x128xf32, #tpu.memory_space<vmem>>, vector<1x128xf32>,
    return
  }
  func.func @transform_0(%arg0: i32) -> (i32, i32) {
    %c0_i32 = arith.constant 0 : i32
    %c0_i32_0 = arith.constant 0 : i32
    return %arg0, %c0_i32 : i32, i32
  }
  func.func @transform_1(%arg0: i32) -> (i32, i32) {
    %c0_i32 = arith.constant 0 : i32
    %c0_i32_0 = arith.constant 0 : i32
    return %arg0, %c0_i32 : i32, i32
  }
  func.func @transform_2(%arg0: i32) -> (i32, i32) {
    %c0_i32 = arith.constant 0 : i32
    %c0_i32_0 = arith.constant 0 : i32
    return %c0_i32, %arg0 : i32, i32
  }
}

</mosaic_0001>

<bundles_post_ra>
// kernel: tpu_custom_call.1
= control target key start
LH: loop header
LB: loop body
LE: loop exit
PB: predicated region body
PF: predicated region fallthrough
CT: control target
= control target key end

     0   :  { %7 = vsyncpa [#allocation3], 0  ;;  %s768_s0 = inlined_call_operand.hbm [shape: f32[16,32], index: 0, kind: input, shape index: {}]   ;;  %s769_s1 = inlined_call_operand.hbm [shape: f32[16,32], index: 1, kind: input, shape index: {}]   ;;  %s770_s2 = inlined_call_operand.hbm [shape: f32[1,256], index: 2, kind: output, shape index: {}]  }
   0x1   :  { %9 = vsyncpa [#allocation3 + $0x1], 0 }
   0x2   :  { %10 = vsyncpa [#allocation6], 0 }
   0x3   :  { %12 = vsyncpa [#allocation6 + $0x1], 0 }
   0x4   :  { %13 = vsyncpa [#allocation4], 0 }
   0x5   :  { %15 = vsyncpa [#allocation4 + $0x1], 0  ;;  %s606_s9 = smov 0   ;;  %s608_s10 = smov 0  }
   0x6   :  { %s610_s11 = smov 0   ;;  %s612_s12 = smov 0  }
   0x7 LB: > { %s627_s13 = sadd.s32 4294967295, %s589_s12   ;;  %s387_s14 = sadd.s32 4294967294, %s589_s12   ;;  %s589_s12 = sphi %s612_s12, %s781_s12   ;;  %s585_s11 = sphi %s610_s11, %s780_s11   ;;  %s581_s10 = sphi %s608_s10, %s779_s10   ;;  %s577_s9 = sphi %s606_s9, %s778_s9  }
   0x8   : > { %s631_s15 = sadd.s32 1, %s589_s12   ;;  %s28_s16 = sadd.s32 1, %s585_s11 }
   0x9   : > { %s25_s17 = ssub.s32 %s589_s12, %s631_s15  ;;  %p35_p0 = scmp.ne.s32.totalorder %s585_s11, %s581_s10 }
   0xa   : > { %p26_p1 = scmp.eq.s32.totalorder %s25_s17, 0  ;;  %p36_p2 = scmp.eq.s32.totalorder %s589_s12, 0 }
   0xb   : > { %p41_p3 = scmp.ne.s32.totalorder %s581_s10, %s577_s9  ;;  %p42_p4 = scmp.eq.s32.totalorder %s627_s13, 0 }
   0xc   : > { %s643_s18 = scalar_select %p26_p1, %s585_s11, %s28_s16  }
   0xd   : > { %p645_p5 = por %p36_p2, %p35_p0  ;;  %p649_p6 = por %p42_p4, %p41_p3 }
   0xe   : > { %p91_p7 = scmp.eq.s32.totalorder %s627_s13, 1  ;;  %p97_p8 = scmp.eq.s32.totalorder %s387_s14, 1 }
   0xf   : > { %p419_p10 = scmp.lt.s32.totalorder %s589_s12, 2  ;;  %s665_s23 = sand.u32 1, %s585_s11  }
  0x10   : > { %p656_p11 = por %p91_p7, %p35_p0  ;;  %p660_p12 = por %p97_p8, %p41_p3 }
  0x11   : > { %s391_s24 = sshll.u32 %s589_s12, 3  ;;  %s390_s25 = sshll.u32 %s665_s23, 3 }
  0x12   : > { %s125_s28 = scalar_lea.hbm %s768_s0, %s391_s24  ;;  %s121_s30 = scalar_lea.vmem [#allocation2], %s390_s25 }
  0x13   : > { %s127_s29 = sshll.u32 %s125_s28, 4  ;;  %s129_s3 = sshll.u32 %s121_s30, 4  ;;  %s128_s29 = int_to_ptr.hbm [resolvable:$true] %s127_s29  ;;  %s130_s3 = int_to_ptr.vmem [resolvable:$true] %s129_s3 }
  0x14   : > { %p674_p13 = pnand %p419_p10, %p645_p5  ;;  %p394_p0 = scmp.ge.s32.totalorder %s589_s12, 1 }
  0x15   : > { %p153_p1 = scmp.lt.s32.totalorder %s589_s12, 3  ;;  %s118_s5 = scalar_lea.sflag [#allocation3], %s665_s23 }
  0x16   : > { %s459_s6 = sshra.s32 %s128_s29, 4  ;;  %p463_p3 = pneg %p674_p13  ;;  %s460_s6 = int_to_ptr.hbm [resolvable:$true] %s459_s6 }
  0x17   : > { %s461_s7 = scalar_lea.hbm %s460_s6, 8  ;;  %s466_s16 = scalar_lea.hbm %s768_s0, 16 }
  0x18   : > { %p462_p2 = scmp.ne.s32.totalorder %s460_s6, %s461_s7  ;;  %p467_p5 = scmp.lt.s32.totalorder %s460_s6, %s768_s0 }
  0x19   : > { %p468_p8 = scmp.lt.s32.totalorder %s466_s16, %s461_s7 }
  0x1a   : > { %p464_p4 = pnand %p463_p3, %p462_p2 }
  0x1b   : > { %p469_p10 = por %p468_p8, %p467_p5 }
  0x1c   : > { %p465_p7 = pneg %p464_p4 }
  0x1e   : > { %p470_p9 = pnand %p469_p10, %p465_p7 }
  0x20   : > { %473 = shalt.err (!%p470_p9)
}
  0x21   : > { %411 = dma.hbm_to_vmem [thread:$0]  (!%p674_p13), %s128_s29, 128, %s130_s3, %s118_s5  }
  0x22   : > { %p698_p2 = pnand %p394_p0, %p153_p1  ;;  %s144_s30 = scalar_lea.hbm %s769_s1, %s391_s24 }
  0x23   : > { %s146_s6 = sshll.u32 %s144_s30, 4  ;;  %s140_s7 = scalar_lea.vmem [#allocation5], %s390_s25  ;;  %s147_s6 = int_to_ptr.hbm [resolvable:$true] %s146_s6 }
  0x24   : > { %s148_s8 = sshll.u32 %s140_s7, 4  ;;  %s137_s14 = scalar_lea.sflag [#allocation6], %s665_s23  ;;  %s149_s8 = int_to_ptr.vmem [resolvable:$true] %s148_s8 }
  0x25   : > { %s489_s16 = sshra.s32 %s147_s6, 4  ;;  %s496_s5 = scalar_lea.hbm %s769_s1, 16  ;;  %s490_s16 = int_to_ptr.hbm [resolvable:$true] %s489_s16 }
  0x26   : > { %s491_s17 = scalar_lea.hbm %s490_s16, 8  ;;  %p497_p4 = scmp.lt.s32.totalorder %s490_s16, %s769_s1 }
  0x27   : > { %p492_p9 = scmp.ne.s32.totalorder %s490_s16, %s491_s17  ;;  %p498_p7 = scmp.lt.s32.totalorder %s496_s5, %s491_s17 }
  0x29   : > { %p494_p0 = pnand %p492_p9, %p463_p3  ;;  %p499_p5 = por %p498_p7, %p497_p4 }
  0x2b   : > { %p495_p1 = pneg %p494_p0 }
  0x2d   : > { %p500_p8 = pnand %p499_p5, %p495_p1 }
  0x2f   : > { %503 = shalt.err (!%p500_p8)
}
  0x30   : > { %414 = dma.hbm_to_vmem [thread:$0]  (!%p674_p13), %s147_s6, 128, %s149_s8, %s137_s14  }
  0x31   : > { %157 = sbr.rel (%p698_p2) target bundleno = 415 (0x19f), region = 28  ;;  %s720_s23 = sand.u32 (!%p698_p2), 1, %s581_s10  }
  0x32   : > { %s395_s25 = sshll.u32 (!%p698_p2), %s720_s23, 3  ;;  %s160_s27 = scalar_lea.sflag (!%p698_p2), [#allocation3], %s720_s23 }
  0x33   : > { %s163_s28 = scalar_lea.vmem (!%p698_p2), [#allocation2], %s395_s25 }
  0x36   : > { %564 = dma.done.wait (%p649_p6), %s160_s27, 128  }
  0x37   : > { %566 = vsyncadd (%p649_p6), %s160_s27, 4294967168  ;;  %s170_s4 = scalar_lea.sflag [#allocation6], %s720_s23  ;;  %s173_s30 = scalar_lea.vmem [#allocation5], %s395_s25 }
  0x38   : > { %568 = dma.done.wait (%p649_p6), %s170_s4, 128  }
  0x39   : > { %570 = vsyncadd (%p649_p6), %s170_s4, 4294967168  ;;  %vm202_vm0 = vcmask 261120   ;;  %v199_v0 = vld [vmem:[%s163_s28] sm:$0xff]  ;;  %v200_v1 = vld [vmem:[%s173_s30] sm:$0xff]  ;;  %v266_v37 = vlaneseq  ;;  %s397_s20 = sshll.u32 %s627_s13, 3  ;;  %vm272_vm14 = vcmask 7168   ;;  %s294_s7 = scalar_lea.hbm %s770_s2, %s627_s13 }
  0x3a   : > { %v206_v2 = vsel %vm202_vm0, %v199_v0, 0.0  ;;  %v201_v3 = vmul.f32 %v200_v1, %v199_v0  ;;  %v225_v5 = vsel %vm202_vm0, %v200_v1, 0.0  ;;  %v268_v45 = vstv %s397_s20  ;;  %s198_s8 = scalar_lea.vmem [#allocation7], %s720_s23  ;;  %s298_s16 = sshll.u32 %s294_s7, 4  ;;  %s299_s16 = int_to_ptr.hbm [resolvable:$true] %s298_s16 }
  0x3b   : > { %207 = vadd.xlane.f32.xlu0 %v206_v2  ;;  %v267_v42 = vshrl.u32 %v266_v37, 7  ;;  %s296_s14 = sshll.u32 %s198_s8, 4  ;;  %s286_s29 = scalar_lea.sflag [#allocation4], %s720_s23  ;;  %s297_s14 = int_to_ptr.vmem [resolvable:$true] %s296_s14 }
  0x3c   : > { %v203_v4 = vsel %vm202_vm0, %v201_v3, 0.0  ;;  %s533_s3 = sshra.s32 %s299_s16, 4  ;;  %s539_s13 = scalar_lea.hbm %s770_s2, 2  ;;  %s534_s3 = int_to_ptr.hbm [resolvable:$true] %s533_s3 }
  0x3d   : > { %204 = vadd.xlane.f32.xlu1 %v203_v4  ;;  %v269_v50 = vadd.s32 %v268_v45, %v267_v42  ;;  %s535_s5 = scalar_lea.hbm %s534_s3, 1  ;;  %p540_p10 = scmp.lt.s32.totalorder %s534_s3, %s770_s2 }
  0x3e   : > { %p536_p6 = scmp.ne.s32.totalorder %s534_s3, %s535_s5  ;;  %p541_p2 = scmp.lt.s32.totalorder %s539_s13, %s535_s5 }
  0x3f   : > { %vm270_vm13 = vcmp.lt.s32.totalorder %v269_v50, 16 }
  0x40   : > { %p537_p13 = pnand %p536_p6, %p656_p11  ;;  %p542_p9 = por %p541_p2, %p540_p10 }
  0x42   : > { %p538_p3 = pneg %p537_p13 }
  0x43   : > { %226 = vadd.xlane.f32.xlu0 %v225_v5 }
  0x44   : > { %p543_p0 = pnand %p542_p9, %p538_p3 }
  0xae   : > { %v208_v6 = vpop.xlane.xlu0 %207 }
  0xaf   : > { %v209_v7 = vadd.f32 1e-07, %v208_v6 }
  0xb0   : > { %v205_v28 = vpop.xlane.xlu1 %204 }
  0xb1   : > { %453 = vrcp.f32 %v209_v7  ;;  %v221_v17 = vand.u32 2147483648, %v209_v7  ;;  %vm215_vm2 = vweird.f32 %v209_v7  ;;  %v219_v19 = vand.u32 2147483647, %v209_v7 }
  0xb3   : > { %v222_v24 = vor.u32 1.1754944e-38, %v221_v17  ;;  %vm220_vm5 = vcmp.eq.f32.partialorder %v219_v19, 8.507059e+37 }
  0xb6   : > { %v227_v8 = vpop.xlane.xlu0 %226 }
  0xb7   : > { %v454_v9 = vpop.eup %453  ;;  %v228_v10 = vadd.f32 1e-07, %v227_v8 }
  0xb8   : > { %v211_v11 = vmul.f32 %v454_v9, %v209_v7  ;;  %vm216_vm1 = vweird.f32 %v454_v9 }
  0xb9   : > { %455 = vrcp.f32 %v228_v10  ;;  %vm217_vm3 = vmor %vm215_vm2, %vm216_vm1  ;;  %v240_v20 = vand.u32 2147483648, %v228_v10  ;;  %v238_v23 = vand.u32 2147483647, %v228_v10  ;;  %vm234_vm6 = vweird.f32 %v228_v10 }
  0xba   : > { %v212_v12 = vsub.f32 1.0, %v211_v11 }
  0xbb   : > { %v241_v27 = vor.u32 1.1754944e-38, %v240_v20  ;;  %vm239_vm8 = vcmp.eq.f32.partialorder %v238_v23, 8.507059e+37 }
  0xbc   : > { %v213_v13 = vmul.f32 %v454_v9, %v212_v12 }
  0xbe   : > { %v214_v16 = vadd.f32 %v454_v9, %v213_v13 }
  0xbf   : > { %v456_v14 = vpop.eup %455 }
  0xc0   : > { %v230_v15 = vmul.f32 %v456_v14, %v228_v10  ;;  %v218_v21 = vsel %vm217_vm3, %v454_v9, %v214_v16  ;;  %vm235_vm4 = vweird.f32 %v456_v14 }
  0xc1   : > { %v223_v26 = vsel %vm220_vm5, %v222_v24, %v218_v21  ;;  %vm236_vm7 = vmor %vm234_vm6, %vm235_vm4 }
  0xc2   : > { %v231_v18 = vsub.f32 1.0, %v230_v15  ;;  %v224_v31 = vmul.f32 %v223_v26, %v205_v28 }
  0xc4   : > { %v232_v22 = vmul.f32 %v456_v14, %v231_v18  ;;  %v244_v43 = vmul.f32 2.0, %v224_v31 }
  0xc6   : > { %v233_v25 = vadd.f32 %v456_v14, %v232_v22 }
  0xc8   : > { %v237_v29 = vsel %vm236_vm7, %v456_v14, %v233_v25 }
  0xc9   : > { %v242_v30 = vsel %vm239_vm8, %v241_v27, %v237_v29 }
  0xca   : > { %v243_v32 = vmul.f32 %v242_v30, %v205_v28 }
  0xcc   : > { %v246_v33 = vadd.f32 %v243_v32, %v224_v31  ;;  %v245_v47 = vmul.f32 %v244_v43, %v243_v32 }
  0xce   : > { %v247_v34 = vadd.f32 1e-07, %v246_v33 }
  0xd0   : > { %457 = vrcp.f32 %v247_v34  ;;  %v259_v39 = vand.u32 2147483648, %v247_v34  ;;  %v257_v41 = vand.u32 2147483647, %v247_v34  ;;  %vm253_vm10 = vweird.f32 %v247_v34 }
  0xd2   : > { %v260_v46 = vor.u32 1.1754944e-38, %v259_v39  ;;  %vm258_vm12 = vcmp.eq.f32.partialorder %v257_v41, 8.507059e+37 }
  0xd6   : > { %v458_v35 = vpop.eup %457 }
  0xd7   : > { %v249_v36 = vmul.f32 %v458_v35, %v247_v34  ;;  %vm254_vm9 = vweird.f32 %v458_v35 }
  0xd8   : > { %vm255_vm11 = vmor %vm253_vm10, %vm254_vm9 }
  0xd9   : > { %v250_v38 = vsub.f32 1.0, %v249_v36 }
  0xdb   : > { %v251_v40 = vmul.f32 %v458_v35, %v250_v38 }
  0xdd   : > { %v252_v44 = vadd.f32 %v458_v35, %v251_v40 }
  0xdf   : > { %v256_v48 = vsel %vm255_vm11, %v458_v35, %v252_v44 }
  0xe0   : > { %v261_v49 = vsel %vm258_vm12, %v260_v46, %v256_v48 }
  0xe1   : > { %v262_v51 = vmul.f32 %v261_v49, %v245_v47 }
  0xe3   : > { %v263_v52 = vmax.f32 %v262_v51, 1e-07 }
  0xe5   : > { %v264_v53 = vmin.f32 %v263_v52, 0.9999999 }
  0xe7   : > { %v271_v54 = vsel %vm270_vm13, %v264_v53, 0.0 }
  0xe8   : > { %v273_v55 = vsel %vm272_vm14, %v271_v54, 0.0 }
  0xe9   : > { %274 = vadd.xlane.f32.xlu1 %v273_v55 }
 0x15c   : > { %v275_v56 = vpop.xlane.xlu1 %274 }
 0x15d   : > { %v276_v57 = vrot.slane %v275_v56, 4 }
 0x15f   : > { %v277_v58 = vadd.f32 %v276_v57, %v275_v56 }
 0x161   : > { %v278_v59 = vrot.slane %v277_v58, 2 }
 0x163   : > { %v279_v60 = vadd.f32 %v278_v59, %v277_v58 }
 0x165   : > { %v280_v61 = vrot.slane %v279_v60, 1 }
 0x167   : > { %v281_v62 = vadd.f32 %v280_v61, %v279_v60 }
 0x169   : > { %400 = vpush %v281_v62 }
 0x19a   : > { %s401_s17 = spop %400 }
 0x19b   : > { %v283_v63 = vstv %s401_s17 }
 0x19c   : > { %284 = vst [vmem:[%s198_s8] sm:$0x1] %v283_v63 }
 0x19d   : > { %546 = shalt.err (!%p543_p0)
}
 0x19e   : > { %406 = dma.vmem_to_hbm [thread:$0]  (%p656_p11), %s297_s14, 16, %s299_s16, %s286_s29  }
 0x19f PF: > { %s310_s23 = sand.u32 1, %s577_s9   ;;  %p777_p1 = scmp.ge.s32.totalorder %s589_s12, 2 }
 0x1a0   : > { %s311_s28 = scalar_lea.sflag [#allocation4], %s310_s23 }
 0x1a1   : > { %p416_p4 = pnand %p777_p1, %p660_p12 }
 0x1a3   : > { %p417_p7 = pneg %p416_p4 }
 0x1a5   : > { %572 = dma.done.wait (%p417_p7), %s311_s28, 16  }
 0x1a6   : > { %574 = vsyncadd (%p417_p7), %s311_s28, 4294967280  ;;  %p18_p5 = scmp.ge.s32.totalorder %s631_s15, 4   ;;  %s778_s9 = smov %s581_s10 }
 0x1a7   : > { %s779_s10 = smov %s585_s11  ;;  %s780_s11 = smov %s643_s18 }
 0x1a8   : > { %s781_s12 = smov %s631_s15  ;;  %20 = sbr.rel (!%p18_p5) target bundleno = 7 (0x7), region = 86 }
 0x1ad   :  { %316 = vsyncpa [#allocation3], 1 }
 0x1ae   :  { %318 = vsyncpa [#allocation3 + $0x1], 1 }
 0x1af   :  { %319 = vsyncpa [#allocation6], 1 }
 0x1b0   :  { %321 = vsyncpa [#allocation6 + $0x1], 1 }
 0x1b1   :  { %322 = vsyncpa [#allocation4], 1 }
 0x1b2   :  { %324 = vsyncpa [#allocation4 + $0x1], 1 }

</bundles_post_ra>
